<compile_context>
chip_gen: v7x
topology: tpu7x:2x2x1
jax: 0.10.0
libtpu: 0.0.40
codegen_flags: <defaults>
</compile_context>

<pallas_src>
import math
import functools
from typing import NamedTuple

import jax
import jax.numpy as jnp
from jax.experimental import pallas as pl
from jax.experimental.pallas import tpu as pltpu


# --------------------------------------------------------------------------- #
# Kernel
# --------------------------------------------------------------------------- #
def arc_margin_kernel(xn_ref, wt_ref, invn_ref, label_ref, out_ref, *,
                      cos_m, sin_m, th, mm, s, easy_margin, tn):
    """One grid step computes a (bt, tn) tile of the output logits.

    xn_ref:    (bt, E)  normalized embeddings, in the weight's stream dtype
    wt_ref:    (E, tn)  raw weight tile in (K, N) layout, native stream dtype
    invn_ref:  (1, tn)  precomputed f32 per-class 1 / max(||w||, eps)
    label_ref: (bt, 1)  int32 class labels
    out_ref:   (bt, tn) output logits tile
    """
    # Native-dtype MXU matmul (bf16 x bf16 when streaming bf16), f32 accumulate.
    dots = jax.lax.dot_general(
        xn_ref[...], wt_ref[...], (((1,), (0,)), ((), ())),
        preferred_element_type=jnp.float32)              # (bt, tn) f32

    # Weight normalization as a per-column scale of the small (bt, tn) result
    # instead of scaling the (E, tn) tile: O(bt*tn) VALU work, no large
    # in-kernel intermediates.
    cosine = dots * invn_ref[...]

    # Clamp to avoid NaN when |cosine| drifts slightly above 1 numerically.
    sine = jnp.sqrt(jnp.maximum(1.0 - cosine * cosine, 0.0))
    phi = cosine * cos_m - sine * sin_m
    if easy_margin:
        phi = jnp.where(cosine > 0.0, phi, cosine)
    else:
        phi = jnp.where(cosine > th, phi, cosine - mm)

    # Fused one-hot select + scale: s * (one_hot*phi + (1-one_hot)*cosine).
    # TODO(synk): for very large B, emit s*cosine only here and apply the phi
    # margin to the single label column per row in an O(B) epilogue (drops the
    # per-element sqrt/selects and 2-3 (bt, tn) f32 temporaries).
    j = pl.program_id(0)
    cls_idx = jax.lax.broadcasted_iota(jnp.int32, cosine.shape, 1) + j * tn
    out_ref[...] = (s * jnp.where(cls_idx == label_ref[...], phi, cosine)
                    ).astype(out_ref.dtype)


# --------------------------------------------------------------------------- #
# Planning helpers (generation-aware VMEM budgeting)
# --------------------------------------------------------------------------- #
def _vmem_capacity_bytes():
    try:
        return int(pltpu.get_tpu_info().vmem_capacity_bytes)
    except Exception:
        return 64 * 1024 * 1024   # conservative fallback: v7x per-TC VMEM


def _round_up(x, m):
    return (x + m - 1) // m * m


def _pick_tn(num_classes, emb_size, *, weight_bytes, out_bytes, bt_hint,
             vmem_budget_bytes, tn_cap=8192):
    """Largest class tile (multiple of 128) that fits the VMEM budget.

    Budget model per grid step (auto-pipelining double-buffers each spec):
      weight tile      2 * E  * tn * weight_bytes
      inv-norm tile    2 * tn * 4
      xn tile          2 * bt * E * weight_bytes
      label tile       2 * bt * 128 * 4           (lane padding of (bt, 1))
      output tile      2 * bt * tn * out_bytes
      f32 temporaries  4 * bt * tn * 4            (dots/cosine/phi/iota/select)
    """
    cap = min(tn_cap, _round_up(num_classes, 128))
    best = 128
    t = 128
    while t <= cap:
        need = (2 * emb_size * t * weight_bytes
                + 2 * t * 4
                + 2 * bt_hint * emb_size * weight_bytes
                + 2 * bt_hint * 128 * 4
                + 2 * bt_hint * t * out_bytes
                + 4 * bt_hint * t * 4)
        if need <= vmem_budget_bytes:
            best = t
        t += 128
    return best


def _pick_bt(batch):
    """Batch tile: 256 rows to fill the MXU M dim on v6e/v7x when B is large."""
    if batch <= 256:
        return batch
    for bt in (256, 128, 64, 32, 16, 8):
        if batch % bt == 0:
            return bt
    return batch


# --------------------------------------------------------------------------- #
# One-time weight preparation (per weight update, NOT per forward call)
# --------------------------------------------------------------------------- #
class ArcMarginParams(NamedTuple):
    w_t: jax.Array        # (E, nc_pad) weight in (K, N) layout, stream dtype
    inv_norm: jax.Array   # (1, nc_pad) f32 per-class 1 / max(||w||, eps)
    num_classes: int      # original class count (padded columns sliced off)
    tn: int               # class tile size (static)


def prepare_arc_margin_weight(weight, *, stream_dtype=jnp.bfloat16,
                              out_dtype=jnp.float32, tn=None, batch_hint=256):
    """Transpose to (E, NC), cast to the streaming dtype (bf16 by default,
    halving HBM weight traffic), precompute per-class inverse L2 norms in f32
    from the original weights, and zero-pad the class axis to a multiple of
    the chosen class tile.  Call once per weight update and reuse across
    forward steps.
    """
    nc, e = weight.shape
    w32 = jnp.asarray(weight, jnp.float32)

    cap = _vmem_capacity_bytes()
    if tn is None:
        tn = _pick_tn(nc, e,
                      weight_bytes=jnp.dtype(stream_dtype).itemsize,
                      out_bytes=jnp.dtype(out_dtype).itemsize,
                      bt_hint=min(int(batch_hint), 256),
                      vmem_budget_bytes=cap // 2)
    tn = int(tn)
    assert tn % 128 == 0, "class tile must be a multiple of 128 (lane width)"

    nc_pad = _round_up(nc, tn)
    eps = 1e-12
    inv = jax.lax.rsqrt(jnp.maximum(jnp.sum(w32 * w32, axis=1), eps * eps))

    w_t = jnp.zeros((e, nc_pad), dtype=stream_dtype)
    w_t = w_t.at[:, :nc].set(w32.T.astype(stream_dtype))
    inv_norm = jnp.zeros((1, nc_pad), dtype=jnp.float32)
    inv_norm = inv_norm.at[0, :nc].set(inv)

    # TODO(synk): add an int8 weight path (per-class quant scale folded into
    # inv_norm) for maximally HBM-starved parts (v5e).
    return ArcMarginParams(w_t=w_t, inv_norm=inv_norm,
                           num_classes=int(nc), tn=tn)


# --------------------------------------------------------------------------- #
# Forward wrapper
# --------------------------------------------------------------------------- #
def arc_margin_forward(x, params: ArcMarginParams, label, *,
                       margin_m=0.5, margin_s=64.0, easy_margin=False,
                       out_dtype=jnp.float32):
    B, E = x.shape
    E2, nc_pad = params.w_t.shape
    assert E == E2
    tn = params.tn
    assert nc_pad % tn == 0

    cos_m = math.cos(margin_m)
    sin_m = math.sin(margin_m)
    th = math.cos(math.pi - margin_m)
    mm = math.sin(math.pi - margin_m) * margin_m

    # Hoisted input-embedding normalization (shared by every class tile),
    # done in f32 then cast to the weight's stream dtype so the MXU runs in
    # the weight's native precision (bf16 when streaming bf16).
    eps = 1e-12
    x32 = x.astype(jnp.float32)
    x_sq = jnp.sum(x32 * x32, axis=-1, keepdims=True)
    xn = (x32 * jax.lax.rsqrt(jnp.maximum(x_sq, eps * eps))).astype(params.w_t.dtype)

    label2d = label.reshape(B, 1).astype(jnp.int32)

    bt = _pick_bt(B)
    assert B % bt == 0
    nb = B // bt
    nj = nc_pad // tn

    kernel = functools.partial(
        arc_margin_kernel, cos_m=cos_m, sin_m=sin_m, th=th, mm=mm,
        s=margin_s, easy_margin=easy_margin, tn=tn)

    cap = _vmem_capacity_bytes()

    # Grid: class axis outermost so the weight tile's block index is constant
    # across the inner batch axis and is NOT re-fetched; xn/label/output tiles
    # are small and cheap to swap per batch step.
    # TODO(synk): if traces show DMA gaps at weight-tile boundaries, deepen the
    # weight stream with pipeline_mode=pl.Buffered(3).
    out_full = pl.pallas_call(
        kernel,
        out_shape=jax.ShapeDtypeStruct((B, nc_pad), out_dtype),
        grid_spec=pltpu.PrefetchScalarGridSpec(
            num_scalar_prefetch=0,
            grid=(nj, nb),
            in_specs=[
                pl.BlockSpec((bt, E), lambda j, b: (b, 0)),   # xn
                pl.BlockSpec((E, tn), lambda j, b: (0, j)),   # weight stream
                pl.BlockSpec((1, tn), lambda j, b: (0, j)),   # inv-norms
                pl.BlockSpec((bt, 1), lambda j, b: (b, 0)),   # labels
            ],
            out_specs=pl.BlockSpec((bt, tn), lambda j, b: (b, j)),
        ),
        compiler_params=pltpu.CompilerParams(
            dimension_semantics=("parallel", "parallel"),
            vmem_limit_bytes=int(0.75 * cap)),
    )(xn, params.w_t, params.inv_norm, label2d)

    if nc_pad != params.num_classes:
        out_full = out_full[:, :params.num_classes]
    return out_full


# --------------------------------------------------------------------------- #
# Pure-JAX reference (mirrors the PyTorch module)
# --------------------------------------------------------------------------- #
def arc_margin_reference(x, weight, label, *,
                         margin_m=0.5, margin_s=64.0, easy_margin=False):
    eps = 1e-12
    xn = x / jnp.maximum(jnp.linalg.norm(x, axis=1, keepdims=True), eps)
    wn = weight / jnp.maximum(jnp.linalg.norm(weight, axis=1, keepdims=True), eps)
    cosine = xn @ wn.T
    sine = jnp.sqrt(jnp.maximum(1.0 - cosine ** 2, 0.0))
    cos_m = math.cos(margin_m)
    sin_m = math.sin(margin_m)
    th = math.cos(math.pi - margin_m)
    mm = math.sin(math.pi - margin_m) * margin_m
    phi = cosine * cos_m - sine * sin_m
    if easy_margin:
        phi = jnp.where(cosine > 0.0, phi, cosine)
    else:
        phi = jnp.where(cosine > th, phi, cosine - mm)
    one_hot = jax.nn.one_hot(label, weight.shape[0], dtype=jnp.float32)
    return margin_s * (one_hot * phi + (1.0 - one_hot) * cosine)


# --------------------------------------------------------------------------- #
# Demo / self-check
# --------------------------------------------------------------------------- #
if __name__ == "__main__":
    key = jax.random.PRNGKey(0)

    # ---------- Case 1: f32 weight stream, NC multiple of 128, auto tile ----
    B, E, NC = 8, 128, 256
    kx, kw, kl = jax.random.split(key, 3)
    x = jax.random.normal(kx, (B, E), dtype=jnp.float32)
    bound = math.sqrt(6.0 / (E + NC))
    weight = jax.random.uniform(kw, (NC, E), minval=-bound, maxval=bound,
                                dtype=jnp.float32)
    label = jax.random.randint(kl, (B,), 0, NC, dtype=jnp.int32)

    params_f32 = prepare_arc_margin_weight(weight, stream_dtype=jnp.float32)

    out = jax.block_until_ready(arc_margin_forward(x, params_f32, label))
    ref = arc_margin_reference(x, weight, label)
    assert out.shape == (B, NC)
    assert jnp.allclose(out, ref, atol=2e-3, rtol=2e-3), "f32 path mismatch"

    out_em = jax.block_until_ready(
        arc_margin_forward(x, params_f32, label, easy_margin=True))
    ref_em = arc_margin_reference(x, weight, label, easy_margin=True)
    assert jnp.allclose(out_em, ref_em, atol=2e-3, rtol=2e-3), \
        "f32 easy_margin path mismatch"

    # ---------- Case 2: default bf16 stream, NC not a multiple of 128, -------
    # ---------- forced tn=128 to exercise padding + multi-tile streaming -----
    NC2 = 300
    kw2, kl2 = jax.random.split(kw)
    weight2 = jax.random.uniform(kw2, (NC2, E), minval=-bound, maxval=bound,
                                 dtype=jnp.float32)
    label2 = jax.random.randint(kl2, (B,), 0, NC2, dtype=jnp.int32)

    params_bf16 = prepare_arc_margin_weight(weight2, tn=128)  # bf16 default

    out2 = jax.block_until_ready(arc_margin_forward(x, params_bf16, label2))
    ref2 = arc_margin_reference(x, weight2, label2)
    assert out2.shape == (B, NC2)
    # bf16 weight/embedding streaming: loose tolerance (f32 accumulate).
    assert jnp.allclose(out2, ref2, atol=0.5, rtol=5e-2), "bf16 path mismatch"

    print("KERNEL_OK")
</pallas_src>

<mosaic_0001>
module attributes {stable_mosaic.version = 11 : i64} {
  func.func @arc_margin_kernel(%arg0: i32, %arg1: i32, %arg2: memref<8x128xf32, #tpu.memory_space<vmem>>, %arg3: memref<128x256xf32, #tpu.memory_space<vmem>>, %arg4: memref<1x256xf32, #tpu.memory_space<vmem>>, %arg5: memref<8x1xi32, #tpu.memory_space<vmem>>, %arg6: memref<8x256xf32, #tpu.memory_space<vmem>>) attributes {dimension_semantics = [#tpu.dimension_semantics<parallel>, #tpu.dimension_semantics<parallel>], iteration_bounds = array<i64: 1, 1>, scalar_prefetch = 0 : i64, scratch_operands = 0 : i64, tpu.core_type = #tpu.core_type<tc>, window_params = [{transform_indices = @transform_0, window_bounds = array<i64: 8, 128>}, {transform_indices = @transform_1, window_bounds = array<i64: 128, 256>}, {transform_indices = @transform_2, window_bounds = array<i64: 1, 256>}, {transform_indices = @transform_3, window_bounds = array<i64: 8, 1>}, {transform_indices = @transform_4, window_bounds = array<i64: 8, 256>}]} {
    %c0 = arith.constant 0 : index
    %c0_0 = arith.constant 0 : index
    %0 = vector.load %arg2[%c0, %c0_0] : memref<8x128xf32, #tpu.memory_space<vmem>>, vector<8x128xf32>
    %c0_1 = arith.constant 0 : index
    %c0_2 = arith.constant 0 : index
    %1 = vector.load %arg3[%c0_1, %c0_2] : memref<128x256xf32, #tpu.memory_space<vmem>>, vector<128x256xf32>
    %cst = arith.constant dense<0.000000e+00> : vector<8x256xf32>
    %2 = tpu.matmul %0, %1, %cst {dimension_numbers = #tpu.dot_dimension_numbers<[1], [0], [0], [1], [0, 0, 1, 1], [], []>} : vector<8x128xf32>, vector<128x256xf32>, vector<8x256xf32> -> vector<8x256xf32>
    %c0_3 = arith.constant 0 : index
    %c0_4 = arith.constant 0 : index
    %3 = vector.load %arg4[%c0_3, %c0_4] : memref<1x256xf32, #tpu.memory_space<vmem>>, vector<1x256xf32>
    %4 = vector.broadcast %3 : vector<1x256xf32> to vector<8x256xf32>
    %5 = arith.mulf %2, %4 : vector<8x256xf32>
    %6 = arith.mulf %5, %5 : vector<8x256xf32>
    %cst_5 = arith.constant 1.000000e+00 : f32
    %7 = vector.broadcast %cst_5 : f32 to vector<8x256xf32>
    %8 = arith.subf %7, %6 : vector<8x256xf32>
    %cst_6 = arith.constant 0.000000e+00 : f32
    %9 = vector.broadcast %cst_6 : f32 to vector<8x256xf32>
    %10 = arith.maximumf %8, %9 : vector<8x256xf32>
    %11 = math.sqrt %10 : vector<8x256xf32>
    %cst_7 = arith.constant 0.87758255 : f32
    %12 = vector.broadcast %cst_7 : f32 to vector<8x256xf32>
    %13 = arith.mulf %5, %12 : vector<8x256xf32>
    %cst_8 = arith.constant 0.47942555 : f32
    %14 = vector.broadcast %cst_8 : f32 to vector<8x256xf32>
    %15 = arith.mulf %11, %14 : vector<8x256xf32>
    %16 = arith.subf %13, %15 : vector<8x256xf32>
    %cst_9 = arith.constant -0.87758255 : f32
    %17 = vector.broadcast %cst_9 : f32 to vector<8x256xf32>
    %18 = arith.cmpf ogt, %5, %17 : vector<8x256xf32>
    %cst_10 = arith.constant 0.239712775 : f32
    %19 = vector.broadcast %cst_10 : f32 to vector<8x256xf32>
    %20 = arith.subf %5, %19 : vector<8x256xf32>
    %21 = arith.select %18, %16, %20 : vector<8x256xi1>, vector<8x256xf32>
    %22 = tpu.iota {dimensions = array<i32: 1>} : vector<8x256xi32>
    %c256_i32 = arith.constant 256 : i32
    %23 = arith.muli %arg0, %c256_i32 : i32
    %24 = vector.broadcast %23 : i32 to vector<8x256xi32>
    %25 = arith.addi %22, %24 : vector<8x256xi32>
    %c0_11 = arith.constant 0 : index
    %c0_12 = arith.constant 0 : index
    %26 = vector.load %arg5[%c0_11, %c0_12] : memref<8x1xi32, #tpu.memory_space<vmem>>, vector<8x1xi32>
    %27 = vector.broadcast %26 : vector<8x1xi32> to vector<8x256xi32>
    %28 = arith.cmpi eq, %25, %27 : vector<8x256xi32>
    %29 = arith.select %28, %21, %5 : vector<8x256xi1>, vector<8x256xf32>
    %cst_13 = arith.constant 6.400000e+01 : f32
    %30 = vector.broadcast %cst_13 : f32 to vector<8x256xf32>
    %31 = arith.mulf %30, %29 : vector<8x256xf32>
    %c0_14 = arith.constant 0 : index
    %c0_15 = arith.constant 0 : index
    %32 = vector.load %arg6[%c0_14, %c0_15] : memref<8x256xf32, #tpu.memory_space<vmem>>, vector<8x256xf32>
    tpu.vector_store %arg6[%c0_14, %c0_15], %31 {strides = array<i32>} : memref<8x256xf32, #tpu.memory_space<vmem>>, vector<8x256xf32>,
    return
  }
  func.func @transform_0(%arg0: i32, %arg1: i32) -> (i32, i32) {
    %c0_i32 = arith.constant 0 : i32
    %c0_i32_0 = arith.constant 0 : i32
    return %arg1, %c0_i32 : i32, i32
  }
  func.func @transform_1(%arg0: i32, %arg1: i32) -> (i32, i32) {
    %c0_i32 = arith.constant 0 : i32
    %c0_i32_0 = arith.constant 0 : i32
    return %c0_i32, %arg0 : i32, i32
  }
  func.func @transform_2(%arg0: i32, %arg1: i32) -> (i32, i32) {
    %c0_i32 = arith.constant 0 : i32
    %c0_i32_0 = arith.constant 0 : i32
    return %c0_i32, %arg0 : i32, i32
  }
  func.func @transform_3(%arg0: i32, %arg1: i32) -> (i32, i32) {
    %c0_i32 = arith.constant 0 : i32
    %c0_i32_0 = arith.constant 0 : i32
    return %arg1, %c0_i32 : i32, i32
  }
  func.func @transform_4(%arg0: i32, %arg1: i32) -> (i32, i32) {
    %c0_i32 = arith.constant 0 : i32
    return %arg1, %arg0 : i32, i32
  }
}

</mosaic_0001>

<bundles_post_ra>
// kernel: tpu_custom_call.1
= control target key start
LH: loop header
LB: loop body
LE: loop exit
PB: predicated region body
PF: predicated region fallthrough
CT: control target
= control target key end

     0   :  { %9 = vsyncpa [#allocation3], 0  ;;  %s373_s0 = inlined_call_operand.vmem [shape: f32[8,128], index: 0, kind: input, shape index: {}]   ;;  %s374_s1 = inlined_call_operand.hbm [shape: f32[128,256], index: 1, kind: input, shape index: {}]   ;;  %s375_s2 = inlined_call_operand.vmem [shape: f32[1,256], index: 2, kind: input, shape index: {}]   ;;  %s376_s3 = inlined_call_operand.vmem [shape: s32[8,1], index: 3, kind: input, shape index: {}]   ;;  %s377_s4 = inlined_call_operand.hbm [shape: f32[8,256], index: 4, kind: output, shape index: {}]  }
   0x1   :  { %10 = vsyncpa [#allocation4], 0  ;;  %s309_s15 = smov [#allocation2]   ;;  %s261_s19 = scalar_lea.hbm %s374_s1, 4096 }
   0x2   :  { %s18_s16 = sshll.u32 %s309_s15, 4  ;;  %p262_p0 = scmp.ne.s32.totalorder %s374_s1, %s261_s19  ;;  %s19_s16 = int_to_ptr.vmem [resolvable:$true] %s18_s16 }
   0x3   :  { %p265_p1 = scmp.lt.u32.totalorder %s261_s19, %s374_s1 }
   0x5   :  { %p267_p2 = pnand %p265_p1, %p262_p0 }
   0x7   :  { %270 = shalt.err (!%p267_p2)
}
   0x8   :  { %s271_s24 = scalar_lea.vmem %s19_s16, 4096  ;;  %p276_p4 = scmp.lt.s32.totalorder %s19_s16, %s19_s16 }
   0x9   :  { %p272_p3 = scmp.ne.s32.totalorder %s19_s16, %s271_s24  ;;  %p277_p5 = scmp.lt.s32.totalorder %s271_s24, %s271_s24 }
   0xb   :  { %p278_p6 = por %p277_p5, %p276_p4 }
   0xd   :  { %p279_p7 = pnand %p278_p6, %p272_p3 }
   0xf   :  { %282 = shalt.err (!%p279_p7)
}
  0x10   :  { %s310_s25 = smov 256   ;;  %s311_s26 = smov 16  }
  0x11   :  { %24 = dma.hbm_to_vmem [thread:$0]  %s374_s1, 4096, %s19_s16, [#allocation3], %s310_s25, %s310_s25, %s311_s26  }
  0x12   :  { %305 = dma.done.wait [#allocation3], 4096  }
  0x13   :  { %306 = vsyncadd [#allocation3], 4294963200  ;;  %v312_v0 = vmov 0.0   ;;  %v313_v1 = vmov 0   ;;  %v34_v2 = vld [vmem:[#allocation2 + $0x8] sm:$0xff]  ;;  %v36_v3 = vld [vmem:[#allocation2 + $0x18] sm:$0xff]  ;;  %v138_v52 = vlaneseq }
  0x14   :  { %129 = vmatprep.mubr.f32.mxu0 %v312_v0  ;;  %256 = vset.pattern.permute.xlu0 %v313_v1  ;;  %v33_v4 = vld [vmem:[#allocation2] sm:$0xff]  ;;  %v218_v5 = vpack.c.bf16 %v36_v3, %v34_v2  ;;  %v35_v6 = vld [vmem:[#allocation2 + $0x10] sm:$0xff]  ;;  %v38_v7 = vld [vmem:[#allocation2 + $0x28] sm:$0xff] }
  0x15   :  { %v40_v8 = vld [vmem:[#allocation2 + $0x38] sm:$0xff]  ;;  %v220_v9 = vpack.c.bf16 %v35_v6, %v33_v4  ;;  %v37_v11 = vld [vmem:[#allocation2 + $0x20] sm:$0xff]  ;;  %v39_v12 = vld [vmem:[#allocation2 + $0x30] sm:$0xff]  ;;  %v139_v53 = vshrl.u32 %v138_v52, 7  ;;  %v183_v6 = vand.u32 127, %v138_v52 }
  0x16   :  { %v222_v10 = vpack.c.bf16 %v40_v8, %v38_v7  ;;  %v42_v13 = vld [vmem:[#allocation2 + $0x48] sm:$0xff]  ;;  %219 = vmatprep.subr.bf16.mxu0 %v218_v5  ;;  %v44_v14 = vld [vmem:[#allocation2 + $0x58] sm:$0xff]  ;;  %v224_v15 = vpack.c.bf16 %v39_v12, %v37_v11  ;;  %v41_v17 = vld [vmem:[#allocation2 + $0x40] sm:$0xff] }
  0x17   :  { %221 = vmatpush1.bf16.msra.mxu0 %v220_v9  ;;  %v226_v16 = vpack.c.bf16 %v44_v14, %v42_v13  ;;  %v43_v18 = vld [vmem:[#allocation2 + $0x50] sm:$0xff]  ;;  %v46_v19 = vld [vmem:[#allocation2 + $0x68] sm:$0xff]  ;;  %v48_v20 = vld [vmem:[#allocation2 + $0x78] sm:$0xff]  ;;  %v140_v54 = vsub.s32 0, %v139_v53  ;;  %v144_v56 = vsub.s32 1, %v139_v53  ;;  %v184_v13 = vadd.s32 128, %v183_v6 }
  0x18   :  { %223 = vmatprep.subr.bf16.mxu0 %v222_v10  ;;  %v228_v21 = vpack.c.bf16 %v43_v18, %v41_v17  ;;  %v230_v22 = vpack.c.bf16 %v48_v20, %v46_v19  ;;  %v45_v23 = vld [vmem:[#allocation2 + $0x60] sm:$0xff]  ;;  %v47_v24 = vld [vmem:[#allocation2 + $0x70] sm:$0xff]  ;;  %v50_v25 = vld [vmem:[#allocation2 + $0x88] sm:$0xff] }
  0x19   :  { %v52_v26 = vld [vmem:[#allocation2 + $0x98] sm:$0xff]  ;;  %v189_v27 = vld [vmem:[%s376_s3] sm:$0xff]  ;;  %v232_v28 = vpack.c.bf16 %v47_v24, %v45_v23  ;;  %v51_v31 = vld [vmem:[#allocation2 + $0x90] sm:$0xff] }
  0x1a   :  { %191 = vperm.xlu0 %256, %v189_v27   ;;  %v234_v29 = vpack.c.bf16 %v52_v26, %v50_v25  ;;  %v49_v30 = vld [vmem:[#allocation2 + $0x80] sm:$0xff]  ;;  %v54_v32 = vld [vmem:[#allocation2 + $0xa8] sm:$0xff]  ;;  %v56_v33 = vld [vmem:[#allocation2 + $0xb8] sm:$0xff] }
  0x1b   :  { %225 = vmatpush1.bf16.msra.mxu0 %v224_v15  ;;  %v236_v34 = vpack.c.bf16 %v51_v31, %v49_v30  ;;  %v238_v35 = vpack.c.bf16 %v56_v33, %v54_v32  ;;  %v53_v36 = vld [vmem:[#allocation2 + $0xa0] sm:$0xff]  ;;  %v55_v37 = vld [vmem:[#allocation2 + $0xb0] sm:$0xff]  ;;  %v58_v38 = vld [vmem:[#allocation2 + $0xc8] sm:$0xff] }
  0x1c   :  { %227 = vmatprep.subr.bf16.mxu0 %v226_v16  ;;  %v60_v39 = vld [vmem:[#allocation2 + $0xd8] sm:$0xff]  ;;  %v240_v40 = vpack.c.bf16 %v55_v37, %v53_v36  ;;  %v57_v42 = vld [vmem:[#allocation2 + $0xc0] sm:$0xff]  ;;  %v59_v43 = vld [vmem:[#allocation2 + $0xd0] sm:$0xff] }
  0x1d   :  { %v242_v41 = vpack.c.bf16 %v60_v39, %v58_v38  ;;  %v62_v44 = vld [vmem:[#allocation2 + $0xe8] sm:$0xff]  ;;  %v64_v45 = vld [vmem:[#allocation2 + $0xf8] sm:$0xff]  ;;  %v244_v46 = vpack.c.bf16 %v59_v43, %v57_v42  ;;  %v61_v48 = vld [vmem:[#allocation2 + $0xe0] sm:$0xff] }
  0x1e   :  { %v246_v47 = vpack.c.bf16 %v64_v45, %v62_v44  ;;  %v63_v49 = vld [vmem:[#allocation2 + $0xf0] sm:$0xff]  ;;  %v32_v51 = vld [vmem:[%s373_s0] sm:$0xff]  ;;  %s314_s0 = smov [#allocation5]  }
  0x1f   :  { %229 = vmatpush1.bf16.msra.mxu0 %v228_v21  ;;  %v248_v50 = vpack.c.bf16 %v63_v49, %v61_v48  ;;  %v136_v55 = vld [vmem:[%s375_s2] sm:$0x3]  ;;  %s207_s2 = sshll.u32 %s314_s0, 4  ;;  %s208_s2 = int_to_ptr.vmem [resolvable:$true] %s207_s2 }
  0x20   :  { %231 = vmatprep.subr.bf16.mxu0 %v230_v22  ;;  %v141_v57 = vrot.slane %v136_v55, %v140_v54  ;;  %v145_v58 = vrot.slane %v136_v55, %v144_v56  ;;  %s283_s7 = scalar_lea.vmem %s208_s2, 256  ;;  %p288_p9 = scmp.lt.s32.totalorder %s208_s2, %s208_s2 }
  0x21   :  { %p284_p8 = scmp.ne.s32.totalorder %s208_s2, %s283_s7  ;;  %p289_p10 = scmp.lt.s32.totalorder %s283_s7, %s283_s7 }
  0x23   :  { %233 = vmatpush1.bf16.msra.mxu0 %v232_v28  ;;  %p290_p11 = por %p289_p10, %p288_p9 }
  0x24   :  { %235 = vmatprep.subr.bf16.mxu0 %v234_v29 }
  0x25   :  { %p291_p12 = pnand %p290_p11, %p284_p8 }
  0x27   :  { %237 = vmatpush1.bf16.msra.mxu0 %v236_v34 }
  0x28   :  { %239 = vmatprep.subr.bf16.mxu0 %v238_v35 }
  0x2b   :  { %241 = vmatpush1.bf16.msra.mxu0 %v240_v40 }
  0x2c   :  { %243 = vmatprep.subr.bf16.mxu0 %v242_v41 }
  0x2f   :  { %245 = vmatpush1.bf16.msra.mxu0 %v244_v46 }
  0x30   :  { %247 = vmatprep.subr.bf16.mxu0 %v246_v47 }
  0x33   :  { %249 = vmatpush1.bf16.msra.mxu0 %v248_v50 }
  0x36   :  { %130 = vmatmul.mubr.f32.vlgmr.msra.gmra.mrb[0].mxu0 %v32_v51 }
  0x99   :  { %v192_v14 = vpop.permute.xlu0 %191 }
  0x9a   :  { %vm193_vm4 = vcmp.eq.s32.totalorder %v183_v6, %v192_v14  ;;  %vm194_vm6 = vcmp.eq.s32.totalorder %v184_v13, %v192_v14 }
 0x109   :  { %v131_v59 = vpop.f32.mrb[0].mxu0 }
 0x10a   :  { %v148_v60 = vmul.f32 %v141_v57, %v131_v59  ;;  %v133_v61 = vpop.f32.mrb[1].mxu0 }
 0x10b   :  { %v149_v62 = vmul.f32 %v145_v58, %v133_v61 }
 0x10c   :  { %v150_v63 = vmul.f32 %v148_v60, %v148_v60  ;;  %v170_v18 = vmul.f32 0.87758255, %v148_v60  ;;  %v216_v23 = vadd.f32 -0.23971277, %v148_v60  ;;  %vm176_vm5 = vcmp.gt.f32.partialorder %v148_v60, -0.87758255 }
 0x10d   :  { %v151_v0 = vmul.f32 %v149_v62, %v149_v62  ;;  %v171_v20 = vmul.f32 0.87758255, %v149_v62  ;;  %v217_v25 = vadd.f32 -0.23971277, %v149_v62  ;;  %vm177_vm7 = vcmp.gt.f32.partialorder %v149_v62, -0.87758255 }
 0x10e   :  { %v152_v1 = vsub.f32 1.0, %v150_v63 }
 0x10f   :  { %v153_v2 = vsub.f32 1.0, %v151_v0 }
 0x110   :  { %v154_v3 = vmax.f32 %v152_v1, 0.0 }
 0x111   :  { %v155_v4 = vmax.f32 %v153_v2, 0.0 }
 0x112   :  { %257 = vrsqrt.f32 %v154_v3  ;;  %vm158_vm0 = vcmp.eq.f32.partialorder %v154_v3, inf  ;;  %v161_v9 = vand.u32 2147483648, %v154_v3  ;;  %vm160_vm1 = vcmp.eq.f32.partialorder %v154_v3, 0.0 }
 0x113   :  { %259 = vrsqrt.f32 %v155_v4  ;;  %vm165_vm2 = vcmp.eq.f32.partialorder %v155_v4, inf  ;;  %v168_v12 = vand.u32 2147483648, %v155_v4  ;;  %vm167_vm3 = vcmp.eq.f32.partialorder %v155_v4, 0.0 }
 0x11c   :  { %v258_v5 = vpop.eup %257 }
 0x11d   :  { %v260_v7 = vpop.eup %259  ;;  %v157_v8 = vmul.f32 %v258_v5, %v154_v3 }
 0x11e   :  { %v164_v10 = vmul.f32 %v260_v7, %v155_v4 }
 0x11f   :  { %v159_v11 = vsel %vm158_vm0, %v154_v3, %v157_v8 }
 0x120   :  { %v162_v15 = vsel %vm160_vm1, %v161_v9, %v159_v11  ;;  %v166_v16 = vsel %vm165_vm2, %v155_v4, %v164_v10 }
 0x121   :  { %v169_v17 = vsel %vm167_vm3, %v168_v12, %v166_v16  ;;  %v172_v19 = vmul.f32 0.47942555, %v162_v15 }
 0x122   :  { %v173_v21 = vmul.f32 0.47942555, %v169_v17 }
 0x123   :  { %v174_v22 = vsub.f32 %v170_v18, %v172_v19 }
 0x124   :  { %v175_v24 = vsub.f32 %v171_v20, %v173_v21 }
 0x125   :  { %v180_v26 = vsel %vm176_vm5, %v174_v22, %v216_v23 }
 0x126   :  { %v181_v27 = vsel %vm177_vm7, %v175_v24, %v217_v25  ;;  %v195_v28 = vsel %vm193_vm4, %v180_v26, %v148_v60 }
 0x127   :  { %v196_v29 = vsel %vm194_vm6, %v181_v27, %v149_v62  ;;  %v197_v30 = vmul.f32 64.0, %v195_v28 }
 0x128   :  { %v198_v31 = vmul.f32 64.0, %v196_v29 }
 0x129   :  { %199 = vst [vmem:[#allocation5] sm:$0xff] %v197_v30 }
 0x12a   :  { %200 = vst [vmem:[#allocation5 + $0x8] sm:$0xff] %v198_v31 }
 0x12b   :  { %294 = shalt.err (!%p291_p12)
}
 0x12c   :  { %s295_s10 = scalar_lea.hbm %s377_s4, 256 }
 0x12d   :  { %p296_p13 = scmp.ne.s32.totalorder %s377_s4, %s295_s10  ;;  %p299_p0 = scmp.lt.u32.totalorder %s295_s10, %s377_s4 }
 0x12f   :  { %p301_p1 = pnand %p299_p0, %p296_p13 }
 0x131   :  { %304 = shalt.err (!%p301_p1)
}
 0x132   :  { %210 = dma.vmem_to_hbm [thread:$0]  %s208_s2, 256, %s377_s4, [#allocation4]  }
 0x133   :  { %307 = dma.done.wait [#allocation4], 256  }
 0x134   :  { %308 = vsyncadd [#allocation4], 4294967040 }
 0x135   :  { %214 = vsyncpa [#allocation3], 1 }
 0x136   :  { %215 = vsyncpa [#allocation4], 1 }

</bundles_post_ra>
